<compile_context>
chip_gen: v5e
topology: v5e:2x2
jax: 0.10.0
libtpu: 0.0.40
codegen_flags: <defaults>
</compile_context>

<pallas_src>
import numpy as np

import jax
import jax.numpy as jnp
from jax.experimental import pallas as pl
from jax.experimental.pallas import tpu as pltpu


# ---------------------------------------------------------------------------
# Pallas kernel (branch `s <= 2` only): assemble (rows, x_cols + tail_cols)
# output from x and the precomputed constant tail, in a single ungridded block
# with one fused store.
# ---------------------------------------------------------------------------
def _make_branch1_call(rows, x_cols, tail_cols, dtype):
    total = x_cols + tail_cols

    def kernel(x_ref, tail_ref, out_ref):
        # One fused store: concat in vregs, single unmasked write to the tile.
        out_ref[...] = jnp.concatenate([x_ref[...], tail_ref[...]], axis=1)

    return pl.pallas_call(
        kernel,
        out_shape=jax.ShapeDtypeStruct((rows, total), dtype),
        in_specs=[
            pl.BlockSpec(memory_space=pltpu.VMEM),
            pl.BlockSpec(memory_space=pltpu.VMEM),
        ],
        out_specs=pl.BlockSpec(memory_space=pltpu.VMEM),
    )


# ---------------------------------------------------------------------------
# Model: deterministic parameter init + forward
# ---------------------------------------------------------------------------
class Model:
    def __init__(self, key):
        k1, k2, k3 = jax.random.split(key, 3)
        # integer values in [1, 10), stored as float32 (see note above)
        self.weight1 = jax.random.randint(k1, (8, 8), 1, 10).astype(jnp.float32)
        self.weight2 = jax.random.randint(k2, (8, 8), 1, 10).astype(jnp.float32)
        self.weight3 = jax.random.randint(k3, (8, 8), 1, 10).astype(jnp.float32)

        # Precomputed constant concatenations (static branches -> zero kernels).
        self._branch2_out = jnp.concatenate(
            [self.weight3, self.weight1, self.weight2], axis=1)          # (8, 24)
        self._branch3_out = jnp.concatenate(
            [self.weight1, self.weight2], axis=1)                        # (8, 16)
        # Constant tail of the dynamic branch (columns 8..63 of the (8,64) out).
        self._branch1_tail = jnp.concatenate(
            [self.weight1] * 6 + [self.weight2], axis=1)                 # (8, 56)

        # Build the Pallas callable once, wrap it in jit so repeat forward
        # calls hit the C++ fast-dispatch path with one compiled executable.
        pallas_fn = _make_branch1_call(rows=8, x_cols=8, tail_cols=56,
                                       dtype=jnp.float32)
        self._branch1_jit = jax.jit(lambda x, tail: pallas_fn(x, tail))
        # Warm up (compile) at init time so forward() never pays compile cost.
        jax.block_until_ready(
            self._branch1_jit(jnp.zeros((8, 8), jnp.float32), self._branch1_tail))

    def forward(self, x):
        # Branch is resolved on the host (output shape differs per branch),
        # exactly as PyTorch eager does.  The scalar is computed by pulling
        # the tiny (8,8) tensor once and summing in NumPy — no extra XLA
        # reduce dispatch, one 256-byte readback.
        s = float(np.asarray(x).sum())
        if s <= 2:
            return self._branch1_jit(x, self._branch1_tail)
        elif s <= 8:
            return self._branch2_out
        else:
            return self._branch3_out


# ---------------------------------------------------------------------------
# Pure-JAX reference for correctness check (same host-side branch rule)
# ---------------------------------------------------------------------------
def reference_forward(model, x):
    s = float(np.asarray(x).sum())
    if s <= 2:
        parts = [x] + [model.weight1] * 6 + [model.weight2]
    elif s <= 8:
        parts = [model.weight3, model.weight1, model.weight2]
    else:
        parts = [model.weight1, model.weight2]
    return jnp.concatenate(parts, axis=1)


if __name__ == "__main__":
    key = jax.random.PRNGKey(0)
    k_x, k_params = jax.random.split(key)

    model = Model(k_params)

    # Base input (8, 8); shift its mean to deterministically hit each branch.
    x_base = jax.random.normal(k_x, (8, 8), dtype=jnp.float32)

    def with_sum(target):
        return x_base + (target - jnp.sum(x_base)) / x_base.size

    x_branch1 = with_sum(0.0)    # sum ~ 0   -> s <= 2   (Pallas kernel path)
    x_branch2 = with_sum(5.0)    # sum ~ 5   -> 2 < s <= 8
    x_branch3 = with_sum(20.0)   # sum ~ 20  -> s > 8

    # Branch 1 (Pallas kernel): run twice to confirm the cached jitted
    # pallas_call and constant tail are reusable, then check the reference.
    out1 = jax.block_until_ready(model.forward(x_branch1))
    out1 = jax.block_until_ready(model.forward(x_branch1))
    ref1 = reference_forward(model, x_branch1)
    assert out1.shape == ref1.shape == (8, 64), (out1.shape, ref1.shape)
    assert jnp.allclose(out1, ref1), "branch-1 Pallas output mismatch"

    # Branch 2 / 3 (precomputed constants): verify against the reference too.
    out2 = jax.block_until_ready(model.forward(x_branch2))
    ref2 = reference_forward(model, x_branch2)
    assert out2.shape == ref2.shape == (8, 24), (out2.shape, ref2.shape)
    assert jnp.allclose(out2, ref2), "branch-2 output mismatch"

    out3 = jax.block_until_ready(model.forward(x_branch3))
    ref3 = reference_forward(model, x_branch3)
    assert out3.shape == ref3.shape == (8, 16), (out3.shape, ref3.shape)
    assert jnp.allclose(out3, ref3), "branch-3 output mismatch"

    print("KERNEL_OK")
</pallas_src>

<mosaic_0001>
module attributes {stable_mosaic.version = 11 : i64} {
  func.func @kernel(%arg0: memref<8x8xf32, #tpu.memory_space<vmem>>, %arg1: memref<8x56xf32, #tpu.memory_space<vmem>>, %arg2: memref<8x64xf32, #tpu.memory_space<vmem>>) attributes {dimension_semantics = [], scalar_prefetch = 0 : i64, scratch_operands = 0 : i64, tpu.core_type = #tpu.core_type<tc>} {
    %c0 = arith.constant 0 : index
    %c0_0 = arith.constant 0 : index
    %0 = vector.load %arg0[%c0, %c0_0] : memref<8x8xf32, #tpu.memory_space<vmem>>, vector<8x8xf32>
    %c0_1 = arith.constant 0 : index
    %c0_2 = arith.constant 0 : index
    %1 = vector.load %arg1[%c0_1, %c0_2] : memref<8x56xf32, #tpu.memory_space<vmem>>, vector<8x56xf32>
    %2 = tpu.concatenate %0, %1 in 1 : vector<8x8xf32>, vector<8x56xf32> -> vector<8x64xf32>
    %c0_3 = arith.constant 0 : index
    %c0_4 = arith.constant 0 : index
    %3 = vector.load %arg2[%c0_3, %c0_4] : memref<8x64xf32, #tpu.memory_space<vmem>>, vector<8x64xf32>
    tpu.vector_store %arg2[%c0_3, %c0_4], %2 {strides = array<i32>} : memref<8x64xf32, #tpu.memory_space<vmem>>, vector<8x64xf32>,
    return
  }
}

</mosaic_0001>

<bundles_post_ra>
// kernel: _lambda_.1
= control target key start
LH: loop header
LB: loop body
LE: loop exit
PB: predicated region body
PF: predicated region fallthrough
CT: control target
= control target key end

     0   :  { %7 = vsyncpa [#allocation3], 0  ;;  %s178_s0 = inlined_call_operand.hbm [shape: f32[8,8], index: 0, kind: input, shape index: {}]   ;;  %s179_s1 = inlined_call_operand.hbm [shape: f32[8,56], index: 1, kind: input, shape index: {}]   ;;  %s180_s2 = inlined_call_operand.hbm [shape: f32[8,64], index: 2, kind: output, shape index: {}]  }
   0x1   :  { %8 = vsyncpa [#allocation6], 0 }
   0x2   :  { %9 = vsyncpa [#allocation4], 0  ;;  %s15_s11 = sshll.u32 %s178_s0, 4  ;;  %s150_s12 = smov [#allocation2]   ;;  %s16_s11 = int_to_ptr.hbm [resolvable:$true] %s15_s11 }
   0x3   :  { %s17_s13 = sshll.u32 %s150_s12, 4  ;;  %s26_s16 = sshll.u32 %s179_s1, 4  ;;  %s18_s13 = int_to_ptr.vmem [resolvable:$true] %s17_s13  ;;  %s27_s16 = int_to_ptr.hbm [resolvable:$true] %s26_s16 }
   0x4   :  { %20 = dma.hbm_to_vmem [thread:$0]  %s16_s11, 128, %s18_s13, [#allocation3]  }
   0x5   :  { %s151_s17 = smov [#allocation5]  }
   0x6   :  { %s28_s18 = sshll.u32 %s151_s17, 4  ;;  %s29_s18 = int_to_ptr.vmem [resolvable:$true] %s28_s18 }
   0x7   :  { %31 = dma.hbm_to_vmem [thread:$0]  %s27_s16, 128, %s29_s18, [#allocation6]  }
   0x8   :  { %144 = dma.done.wait [#allocation3], 128  }
   0x9   :  { %145 = vsyncadd [#allocation3], 4294967168 }
   0xa   :  { %146 = dma.done.wait [#allocation6], 128  }
   0xb   :  { %147 = vsyncadd [#allocation6], 4294967168  ;;  %v41_v0 = vld [vmem:[#allocation5] sm:$0xff]  ;;  %s152_s0 = smov 8   ;;  %s153_s19 = smov [#allocation7]   ;;  %v40_v1 = vld [vmem:[#allocation2] sm:$0xff] }
   0xc   :  { %43 = vrot.lane.b32.xlu0 %v41_v0, %s152_s0  ;;  %s55_s20 = sshll.u32 %s153_s19, 4  ;;  %s57_s23 = sshll.u32 %s180_s2, 4  ;;  %vm46_vm0 = vcmask 64512   ;;  %vm48_vm1 = vcmask 523264   ;;  %s56_s20 = int_to_ptr.vmem [resolvable:$true] %s55_s20  ;;  %s58_s23 = int_to_ptr.hbm [resolvable:$true] %s57_s23 }
  0x7e   :  { %v44_v2 = vpop.permute.xlu0 %43 }
  0x7f   :  { %v47_v3 = vsel %vm46_vm0, %v40_v1, %v44_v2 }
  0x80   :  { %49 = vst.msk [vmem:[#allocation7] sm:$0xff] %vm48_vm1, %v47_v3 }
  0x81   :  { %60 = dma.vmem_to_hbm [thread:$0]  %s56_s20, 128, %s58_s23, [#allocation4]  }
  0x82   :  { %148 = dma.done.wait [#allocation4], 128  }
  0x83   :  { %149 = vsyncadd [#allocation4], 4294967168 }
  0x84   :  { %65 = vsyncpa [#allocation3], 1 }
  0x85   :  { %66 = vsyncpa [#allocation6], 1 }
  0x86   :  { %67 = vsyncpa [#allocation4], 1 }

</bundles_post_ra>
